<compile_context>
chip_gen: v7x
topology: tpu7x:2x2x1
jax: 0.10.0
libtpu: 0.0.40
codegen_flags: <defaults>
</compile_context>

<pallas_src>
import functools

import jax
import jax.numpy as jnp
from jax import lax
from jax.experimental import pallas as pl
from jax.experimental.pallas import tpu as pltpu


_LN_EPS = 1e-5
# Token-row block size for the pipelined grids (clamped to the actual extent for
# the small demo shapes). 256 rows keeps DMA/compute overlapped and fits VMEM at
# real LDM sizes (D~320, ff_inner~1280) on v5e/v6e/v7x.
_TOKEN_BLOCK = 256
# MXU input dtype for the matmuls. Set to jnp.bfloat16 in production on
# v5e/v6e/v7x (2x MXU throughput, half the HBM/VMEM bytes); accumulation stays
# f32 via preferred_element_type. Kept f32 here so the f32 reference check is tight.
_MM_DTYPE = jnp.float32


def _mm(a, b):
    return jnp.dot(a.astype(_MM_DTYPE), b.astype(_MM_DTYPE),
                   preferred_element_type=jnp.float32)


def _mm_nt(a, b):
    # a @ b.T without materializing a transpose: contract the last axis of both.
    return lax.dot_general(a.astype(_MM_DTYPE), b.astype(_MM_DTYPE),
                           (((1,), (1,)), ((), ())),
                           preferred_element_type=jnp.float32)


def _layer_norm(x, gamma, beta):
    mu = jnp.mean(x, axis=-1, keepdims=True)
    xc = x - mu
    var = jnp.mean(xc * xc, axis=-1, keepdims=True)
    return xc * lax.rsqrt(var + _LN_EPS) * gamma + beta


# --------------------- K/V projection (optionally LN-fused) ------------------
def _kv_kernel(*refs, apply_ln):
    if apply_ln:
        ctx_ref, g_ref, b_ref, wk_ref, wv_ref, k_ref, v_ref = refs
    else:
        ctx_ref, wk_ref, wv_ref, k_ref, v_ref = refs
    c = ctx_ref[0]                                   # (tm, Dc)
    if apply_ln:
        c = _layer_norm(c, g_ref[...], b_ref[...])
    k_ref[0] = _mm(c, wk_ref[...])
    v_ref[0] = _mm(c, wv_ref[...])


def _kv_projection(ctx, wk, wv, ln_g, ln_b, *, apply_ln):
    B, M, Dc = ctx.shape
    inner = wk.shape[1]
    tm = min(_TOKEN_BLOCK, M)
    grid = (B, pl.cdiv(M, tm))

    def full(arr):
        return pl.BlockSpec(arr.shape, lambda b, j: (0,) * arr.ndim)

    in_specs = [pl.BlockSpec((1, tm, Dc), lambda b, j: (b, j, 0))]
    args = [ctx]
    if apply_ln:
        g2, b2 = ln_g.reshape(1, Dc), ln_b.reshape(1, Dc)
        in_specs += [full(g2), full(b2)]
        args += [g2, b2]
    in_specs += [full(wk), full(wv)]
    args += [wk, wv]

    out_spec = pl.BlockSpec((1, tm, inner), lambda b, j: (b, j, 0))
    k, v = pl.pallas_call(
        functools.partial(_kv_kernel, apply_ln=apply_ln),
        out_shape=(jax.ShapeDtypeStruct((B, M, inner), jnp.float32),
                   jax.ShapeDtypeStruct((B, M, inner), jnp.float32)),
        grid=grid,
        in_specs=in_specs,
        out_specs=(out_spec, out_spec),
        compiler_params=pltpu.CompilerParams(
            dimension_semantics=("parallel", "parallel")),
    )(*args)
    return k, v


# --------------- fused LN -> Q -> attention -> out-proj -> +residual ---------
def _attn_kernel(x_ref, g_ref, b_ref, wq_ref, k_ref, v_ref, wo_ref, bo_ref, o_ref,
                 *, heads, scale):
    x = x_ref[0]                                     # (tq, D) raw (pre-LN) block
    xn = _layer_norm(x, g_ref[...], b_ref[...])
    # Scale folded into Q once (tq, inner) instead of into every (tq, M) score matrix.
    q = _mm(xn, wq_ref[...]) * scale                 # (tq, inner)
    k = k_ref[0]                                     # (M, inner)
    v = v_ref[0]                                     # (M, inner)
    wo = wo_ref[...]                                 # (inner, D)
    inner = q.shape[-1]
    dh = inner // heads

    # Start the accumulator with the fused residual + out-proj bias.
    out = bo_ref[...] + x                            # (tq, D)

    # TODO(synk): for production sequence lengths (N ~ 4096), tile the KV axis with
    # an online-softmax (flash) loop instead of materializing the full (tq, M) scores.
    for h in range(heads):                           # static unroll over heads
        lo, hi = h * dh, (h + 1) * dh
        s = _mm_nt(q[:, lo:hi], k[:, lo:hi])                 # (tq, M)
        s = s - jnp.max(s, axis=-1, keepdims=True)
        p = jnp.exp(s)
        inv_l = pl.reciprocal(jnp.sum(p, axis=-1, keepdims=True), approx=True)
        # Normalize AFTER the P @ V matmul: multiply a (tq, dh) tile, not (tq, M).
        o_h = _mm(p, v[:, lo:hi]) * inv_l                    # (tq, dh)
        # Fold this head directly into the output projection (row-sliced Wo);
        # avoids a lane-axis concatenate of the per-head slabs.
        out = out + _mm(o_h, wo[lo:hi, :])                   # (tq, D)

    o_ref[0] = out.astype(o_ref.dtype)


def fused_attention_block(x, context, p, ln_g, ln_b, heads, *, self_attn):
    """x = CrossAttention(LayerNorm(x), context) + x, fused into two kernels."""
    B, N, D = x.shape
    M = context.shape[1]
    inner = p["wq"].shape[1]
    dh = inner // heads
    scale = float(dh) ** -0.5

    # K/V projection of the context (LayerNorm fused in for self-attention,
    # where the reference applies the same norm to the context).
    k, v = _kv_projection(context, p["wk"], p["wv"], ln_g, ln_b, apply_ln=self_attn)

    tq = min(_TOKEN_BLOCK, N)
    grid = (B, pl.cdiv(N, tq))
    g2, b2 = ln_g.reshape(1, D), ln_b.reshape(1, D)
    bo2 = p["bo"].reshape(1, D)

    def full(arr):
        return pl.BlockSpec(arr.shape, lambda b, i: (0,) * arr.ndim)

    return pl.pallas_call(
        functools.partial(_attn_kernel, heads=heads, scale=scale),
        out_shape=jax.ShapeDtypeStruct((B, N, D), x.dtype),
        grid=grid,
        in_specs=[
            pl.BlockSpec((1, tq, D), lambda b, i: (b, i, 0)),     # x (raw, also residual)
            full(g2), full(b2), full(p["wq"]),
            pl.BlockSpec((1, M, inner), lambda b, i: (b, 0, 0)),  # K (resident across i)
            pl.BlockSpec((1, M, inner), lambda b, i: (b, 0, 0)),  # V (resident across i)
            full(p["wo"]), full(bo2),
        ],
        out_specs=pl.BlockSpec((1, tq, D), lambda b, i: (b, i, 0)),
        compiler_params=pltpu.CompilerParams(
            dimension_semantics=("parallel", "parallel")),
    )(x, g2, b2, p["wq"], k, v, p["wo"], bo2)


# ----------------- fused LN -> GEGLU FF -> +residual --------------------------
def _ff_kernel(x_ref, g_ref, b_ref, wa_ref, ba_ref, wg_ref, bg_ref, w2_ref, b2_ref,
               o_ref):
    x = x_ref[...]                                   # (tb, D) raw block
    xn = _layer_norm(x, g_ref[...], b_ref[...])
    a = _mm(xn, wa_ref[...]) + ba_ref[...]           # GEGLU "value" branch
    g = _mm(xn, wg_ref[...]) + bg_ref[...]           # GEGLU "gate" branch
    gelu = 0.5 * g * (1.0 + lax.erf(g * (2.0 ** -0.5)))   # exact (erf) GELU
    out = _mm(a * gelu, w2_ref[...]) + b2_ref[...] + x     # proj + fused residual
    o_ref[...] = out.astype(o_ref.dtype)


def fused_ff_block(x, p, ln_g, ln_b):
    """x = FeedForward(LayerNorm(x)) + x  (GEGLU), fused into one kernel."""
    B, N, D = x.shape
    T = B * N
    x2d = x.reshape(T, D)                            # free (contiguous) reshape
    two_inner = p["w1"].shape[1]
    inner = two_inner // 2
    # Split the GEGLU projection into value / gate weights so the kernel never
    # slices the wide (tb, 2*inner) intermediate.
    wa, wg = p["w1"][:, :inner], p["w1"][:, inner:]
    ba, bg = p["b1"][:inner].reshape(1, inner), p["b1"][inner:].reshape(1, inner)
    g2, b2 = ln_g.reshape(1, D), ln_b.reshape(1, D)
    b2o = p["b2"].reshape(1, D)

    tb = min(_TOKEN_BLOCK, T)
    grid = (pl.cdiv(T, tb),)

    def full(arr):
        return pl.BlockSpec(arr.shape, lambda i: (0,) * arr.ndim)

    out = pl.pallas_call(
        _ff_kernel,
        out_shape=jax.ShapeDtypeStruct((T, D), x.dtype),
        grid=grid,
        in_specs=[
            pl.BlockSpec((tb, D), lambda i: (i, 0)),
            full(g2), full(b2), full(wa), full(ba), full(wg), full(bg),
            full(p["w2"]), full(b2o),
        ],
        out_specs=pl.BlockSpec((tb, D), lambda i: (i, 0)),
        compiler_params=pltpu.CompilerParams(dimension_semantics=("parallel",)),
    )(x2d, g2, b2, wa, ba, wg, bg, p["w2"], b2o)
    return out.reshape(B, N, D)


# ----------------------------- Full block ------------------------------------
def basic_transformer_block(x, context, P, heads):
    # x = attn1(norm1(x)) + x   (self-attention: context = norm1(x))
    x = fused_attention_block(x, x, P["attn1"], P["ln1_g"], P["ln1_b"], heads,
                              self_attn=True)
    # x = attn2(norm2(x), context) + x
    x = fused_attention_block(x, context, P["attn2"], P["ln2_g"], P["ln2_b"], heads,
                              self_attn=False)
    # x = ff(norm3(x)) + x
    x = fused_ff_block(x, P["ff"], P["ln3_g"], P["ln3_b"])
    return x


# ----------------------------- Pure-JAX reference ----------------------------
def _reference(x, context, P, heads):
    hp = lax.Precision.HIGHEST

    def ln(z, g, b):
        mu = z.mean(-1, keepdims=True)
        var = ((z - mu) ** 2).mean(-1, keepdims=True)
        return (z - mu) / jnp.sqrt(var + _LN_EPS) * g + b

    def attn(xq, ctx, p):
        B, N, D = xq.shape
        M = ctx.shape[1]
        inner = p["wq"].shape[1]
        dh = inner // heads
        q = jnp.einsum("bnd,de->bne", xq, p["wq"], precision=hp)
        k = jnp.einsum("bmd,de->bme", ctx, p["wk"], precision=hp)
        v = jnp.einsum("bmd,de->bme", ctx, p["wv"], precision=hp)
        q = q.reshape(B, N, heads, dh).transpose(0, 2, 1, 3)
        k = k.reshape(B, M, heads, dh).transpose(0, 2, 1, 3)
        v = v.reshape(B, M, heads, dh).transpose(0, 2, 1, 3)
        sim = jnp.einsum("bhid,bhjd->bhij", q, k, precision=hp) * (float(dh) ** -0.5)
        p_attn = jax.nn.softmax(sim, axis=-1)
        o = jnp.einsum("bhij,bhjd->bhid", p_attn, v, precision=hp)
        o = o.transpose(0, 2, 1, 3).reshape(B, N, inner)
        return jnp.einsum("bne,ed->bnd", o, p["wo"], precision=hp) + p["bo"]

    def ff(z, p):
        inner = p["w1"].shape[1] // 2
        h = jnp.einsum("td,de->te", z, p["w1"], precision=hp) + p["b1"]
        a, g = h[:, :inner], h[:, inner:]
        ge = 0.5 * g * (1.0 + lax.erf(g / jnp.sqrt(2.0)))
        return jnp.einsum("te,ed->td", a * ge, p["w2"], precision=hp) + p["b2"]

    B, N, D = x.shape
    x = attn(ln(x, P["ln1_g"], P["ln1_b"]), ln(x, P["ln1_g"], P["ln1_b"]), P["attn1"]) + x
    x = attn(ln(x, P["ln2_g"], P["ln2_b"]), context, P["attn2"]) + x
    x = ff(ln(x, P["ln3_g"], P["ln3_b"]).reshape(B * N, D), P["ff"]).reshape(B, N, D) + x
    return x


# ----------------------------- Parameters ------------------------------------
def init_params(key, dim, heads, d_head, context_dim):
    inner = heads * d_head
    ff_inner = dim * 4
    ks = jax.random.split(key, 22)

    def w(k, shape, scale=0.05):
        return scale * jax.random.normal(k, shape, jnp.float32)

    return {
        "ln1_g": 1.0 + w(ks[0], (dim,)), "ln1_b": w(ks[1], (dim,)),
        "ln2_g": 1.0 + w(ks[2], (dim,)), "ln2_b": w(ks[3], (dim,)),
        "ln3_g": 1.0 + w(ks[4], (dim,)), "ln3_b": w(ks[5], (dim,)),
        "attn1": {
            "wq": w(ks[6], (dim, inner)), "wk": w(ks[7], (dim, inner)),
            "wv": w(ks[8], (dim, inner)), "wo": w(ks[9], (inner, dim)),
            "bo": w(ks[10], (dim,)),
        },
        "attn2": {
            "wq": w(ks[11], (dim, inner)), "wk": w(ks[12], (context_dim, inner)),
            "wv": w(ks[13], (context_dim, inner)), "wo": w(ks[14], (inner, dim)),
            "bo": w(ks[15], (dim,)),
        },
        "ff": {
            "w1": w(ks[16], (dim, 2 * ff_inner)), "b1": w(ks[17], (2 * ff_inner,)),
            "w2": w(ks[18], (ff_inner, dim)), "b2": w(ks[19], (dim,)),
        },
    }


if __name__ == "__main__":
    # Small shapes consistent with the module: dim=32, n_heads=4, d_head=8.
    B, N, D = 2, 16, 32
    heads, d_head = 4, 8
    M, Dc = 8, 32  # context: (B, M, Dc)

    key = jax.random.PRNGKey(0)
    kx, kc, kp = jax.random.split(key, 3)
    x = jax.random.normal(kx, (B, N, D), jnp.float32)
    context = jax.random.normal(kc, (B, M, Dc), jnp.float32)
    P = init_params(kp, D, heads, d_head, Dc)

    out = jax.block_until_ready(basic_transformer_block(x, context, P, heads))
    ref = jax.block_until_ready(_reference(x, context, P, heads))

    err = float(jnp.max(jnp.abs(out - ref)))
    assert out.shape == (B, N, D)
    # Tolerance accounts for the EUP approximate reciprocal in the softmax
    # normalization (everything else is f32 with f32 accumulation).
    assert err < 1e-2, f"mismatch vs reference: {err}"

    print("KERNEL_OK")
</pallas_src>

<mosaic_0001>
module attributes {stable_mosaic.version = 11 : i64} {
  func.func @_kv_kernel(%arg0: i32, %arg1: i32, %arg2: memref<1x16x32xf32, #tpu.memory_space<vmem>>, %arg3: memref<1x32xf32, #tpu.memory_space<vmem>>, %arg4: memref<1x32xf32, #tpu.memory_space<vmem>>, %arg5: memref<32x32xf32, #tpu.memory_space<vmem>>, %arg6: memref<32x32xf32, #tpu.memory_space<vmem>>, %arg7: memref<1x16x32xf32, #tpu.memory_space<vmem>>, %arg8: memref<1x16x32xf32, #tpu.memory_space<vmem>>) attributes {dimension_semantics = [#tpu.dimension_semantics<parallel>, #tpu.dimension_semantics<parallel>], iteration_bounds = array<i64: 2, 1>, scalar_prefetch = 0 : i64, scratch_operands = 0 : i64, tpu.core_type = #tpu.core_type<tc>, window_params = [{transform_indices = @transform_0, window_bounds = array<i64: 1, 16, 32>}, {pipeline_mode = #tpu.pipeline_mode<synchronous>, transform_indices = @transform_1, window_bounds = array<i64: 1, 32>}, {pipeline_mode = #tpu.pipeline_mode<synchronous>, transform_indices = @transform_2, window_bounds = array<i64: 1, 32>}, {pipeline_mode = #tpu.pipeline_mode<synchronous>, transform_indices = @transform_3, window_bounds = array<i64: 32, 32>}, {pipeline_mode = #tpu.pipeline_mode<synchronous>, transform_indices = @transform_4, window_bounds = array<i64: 32, 32>}, {transform_indices = @transform_5, window_bounds = array<i64: 1, 16, 32>}, {transform_indices = @transform_6, window_bounds = array<i64: 1, 16, 32>}]} {
    %c0 = arith.constant 0 : index
    %c0_0 = arith.constant 0 : index
    %c0_1 = arith.constant 0 : index
    %0 = vector.load %arg2[%c0, %c0_0, %c0_1] : memref<1x16x32xf32, #tpu.memory_space<vmem>>, vector<1x16x32xf32>
    %1 = vector.shape_cast %0 : vector<1x16x32xf32> to vector<16x32xf32>
    %c0_2 = arith.constant 0 : index
    %c0_3 = arith.constant 0 : index
    %2 = vector.load %arg3[%c0_2, %c0_3] : memref<1x32xf32, #tpu.memory_space<vmem>>, vector<1x32xf32>
    %c0_4 = arith.constant 0 : index
    %c0_5 = arith.constant 0 : index
    %3 = vector.load %arg4[%c0_4, %c0_5] : memref<1x32xf32, #tpu.memory_space<vmem>>, vector<1x32xf32>
    %cst = arith.constant dense<0.000000e+00> : vector<16xf32>
    %4 = vector.multi_reduction <add>, %1, %cst [1] : vector<16x32xf32> to vector<16xf32>
    %5 = vector.shape_cast %4 : vector<16xf32> to vector<16x1xf32>
    %cst_6 = arith.constant 3.200000e+01 : f32
    %6 = vector.broadcast %cst_6 : f32 to vector<16x1xf32>
    %7 = arith.divf %5, %6 : vector<16x1xf32>
    %8 = vector.broadcast %7 : vector<16x1xf32> to vector<16x32xf32>
    %9 = arith.subf %1, %8 : vector<16x32xf32>
    %10 = arith.mulf %9, %9 : vector<16x32xf32>
    %cst_7 = arith.constant dense<0.000000e+00> : vector<16xf32>
    %11 = vector.multi_reduction <add>, %10, %cst_7 [1] : vector<16x32xf32> to vector<16xf32>
    %12 = vector.shape_cast %11 : vector<16xf32> to vector<16x1xf32>
    %cst_8 = arith.constant 3.200000e+01 : f32
    %13 = vector.broadcast %cst_8 : f32 to vector<16x1xf32>
    %14 = arith.divf %12, %13 : vector<16x1xf32>
    %cst_9 = arith.constant 9.99999974E-6 : f32
    %15 = vector.broadcast %cst_9 : f32 to vector<16x1xf32>
    %16 = arith.addf %14, %15 : vector<16x1xf32>
    %17 = math.rsqrt %16 : vector<16x1xf32>
    %18 = vector.broadcast %17 : vector<16x1xf32> to vector<16x32xf32>
    %19 = arith.mulf %9, %18 : vector<16x32xf32>
    %20 = vector.broadcast %2 : vector<1x32xf32> to vector<16x32xf32>
    %21 = arith.mulf %19, %20 : vector<16x32xf32>
    %22 = vector.broadcast %3 : vector<1x32xf32> to vector<16x32xf32>
    %23 = arith.addf %21, %22 : vector<16x32xf32>
    %c0_10 = arith.constant 0 : index
    %c0_11 = arith.constant 0 : index
    %24 = vector.load %arg5[%c0_10, %c0_11] : memref<32x32xf32, #tpu.memory_space<vmem>>, vector<32x32xf32>
    %cst_12 = arith.constant dense<0.000000e+00> : vector<16x32xf32>
    %25 = tpu.matmul %23, %24, %cst_12 {dimension_numbers = #tpu.dot_dimension_numbers<[1], [0], [0], [1], [0, 0, 1, 1], [], []>} : vector<16x32xf32>, vector<32x32xf32>, vector<16x32xf32> -> vector<16x32xf32>
    %c0_13 = arith.constant 0 : index
    %c0_14 = arith.constant 0 : index
    %c0_15 = arith.constant 0 : index
    %26 = vector.load %arg7[%c0_13, %c0_14, %c0_15] : memref<1x16x32xf32, #tpu.memory_space<vmem>>, vector<1x16x32xf32>
    %27 = vector.shape_cast %26 : vector<1x16x32xf32> to vector<16x32xf32>
    %28 = vector.shape_cast %25 : vector<16x32xf32> to vector<1x16x32xf32>
    tpu.vector_store %arg7[%c0_13, %c0_14, %c0_15], %28 {strides = array<i32>} : memref<1x16x32xf32, #tpu.memory_space<vmem>>, vector<1x16x32xf32>,
    %c0_16 = arith.constant 0 : index
    %c0_17 = arith.constant 0 : index
    %29 = vector.load %arg6[%c0_16, %c0_17] : memref<32x32xf32, #tpu.memory_space<vmem>>, vector<32x32xf32>
    %cst_18 = arith.constant dense<0.000000e+00> : vector<16x32xf32>
    %30 = tpu.matmul %23, %29, %cst_18 {dimension_numbers = #tpu.dot_dimension_numbers<[1], [0], [0], [1], [0, 0, 1, 1], [], []>} : vector<16x32xf32>, vector<32x32xf32>, vector<16x32xf32> -> vector<16x32xf32>
    %c0_19 = arith.constant 0 : index
    %c0_20 = arith.constant 0 : index
    %c0_21 = arith.constant 0 : index
    %31 = vector.load %arg8[%c0_19, %c0_20, %c0_21] : memref<1x16x32xf32, #tpu.memory_space<vmem>>, vector<1x16x32xf32>
    %32 = vector.shape_cast %31 : vector<1x16x32xf32> to vector<16x32xf32>
    %33 = vector.shape_cast %30 : vector<16x32xf32> to vector<1x16x32xf32>
    tpu.vector_store %arg8[%c0_19, %c0_20, %c0_21], %33 {strides = array<i32>} : memref<1x16x32xf32, #tpu.memory_space<vmem>>, vector<1x16x32xf32>,
    return
  }
  func.func @transform_0(%arg0: i32, %arg1: i32) -> (i32, i32, i32) {
    %c0_i32 = arith.constant 0 : i32
    %c0_i32_0 = arith.constant 0 : i32
    return %arg0, %arg1, %c0_i32 : i32, i32, i32
  }
  func.func @transform_1(%arg0: i32, %arg1: i32) -> (i32, i32) {
    %c0_i32 = arith.constant 0 : i32
    %c0_i32_0 = arith.constant 0 : i32
    %c0_i32_1 = arith.constant 0 : i32
    return %c0_i32, %c0_i32_0 : i32, i32
  }
  func.func @transform_2(%arg0: i32, %arg1: i32) -> (i32, i32) {
    %c0_i32 = arith.constant 0 : i32
    %c0_i32_0 = arith.constant 0 : i32
    %c0_i32_1 = arith.constant 0 : i32
    return %c0_i32, %c0_i32_0 : i32, i32
  }
  func.func @transform_3(%arg0: i32, %arg1: i32) -> (i32, i32) {
    %c0_i32 = arith.constant 0 : i32
    %c0_i32_0 = arith.constant 0 : i32
    %c0_i32_1 = arith.constant 0 : i32
    return %c0_i32, %c0_i32_0 : i32, i32
  }
  func.func @transform_4(%arg0: i32, %arg1: i32) -> (i32, i32) {
    %c0_i32 = arith.constant 0 : i32
    %c0_i32_0 = arith.constant 0 : i32
    %c0_i32_1 = arith.constant 0 : i32
    return %c0_i32, %c0_i32_0 : i32, i32
  }
  func.func @transform_5(%arg0: i32, %arg1: i32) -> (i32, i32, i32) {
    %c0_i32 = arith.constant 0 : i32
    %c0_i32_0 = arith.constant 0 : i32
    return %arg0, %arg1, %c0_i32 : i32, i32, i32
  }
  func.func @transform_6(%arg0: i32, %arg1: i32) -> (i32, i32, i32) {
    %c0_i32 = arith.constant 0 : i32
    %c0_i32_0 = arith.constant 0 : i32
    return %arg0, %arg1, %c0_i32 : i32, i32, i32
  }
}

</mosaic_0001>

<bundles_post_ra>
// kernel: tpu_custom_call.1
= control target key start
LH: loop header
LB: loop body
LE: loop exit
PB: predicated region body
PF: predicated region fallthrough
CT: control target
= control target key end

     0   :  { %12 = vsyncpa [#allocation3], 0  ;;  %s1481_s0 = inlined_call_operand.hbm [shape: f32[2,16,32], index: 0, kind: input, shape index: {}]   ;;  %s1482_s1 = inlined_call_operand.vmem [shape: f32[1,32], index: 1, kind: input, shape index: {}]   ;;  %s1483_s2 = inlined_call_operand.vmem [shape: f32[1,32], index: 2, kind: input, shape index: {}]   ;;  %s1484_s3 = inlined_call_operand.hbm [shape: f32[32,32], index: 3, kind: input, shape index: {}]   ;;  %s1485_s4 = inlined_call_operand.hbm [shape: f32[32,32], index: 4, kind: input, shape index: {}]   ;;  %s1486_s5 = inlined_call_operand.hbm [shape: f32[2,16,32], index: 5, kind: output, shape index: {0}]   ;;  %s1487_s6 = inlined_call_operand.hbm [shape: f32[2,16,32], index: 6, kind: output, shape index: {1}]  }
   0x1   :  { %14 = vsyncpa [#allocation3 + $0x1], 0 }
   0x2   :  { %15 = vsyncpa [#allocation6], 0 }
   0x3   :  { %16 = vsyncpa [#allocation4], 0 }
   0x4   :  { %18 = vsyncpa [#allocation4 + $0x1], 0 }
   0x5   :  { %19 = vsyncpa [#allocation10], 0 }
   0x6   :  { %21 = vsyncpa [#allocation10 + $0x1], 0  ;;  %s1157_s21 = smov 0   ;;  %s1159_s22 = smov 0  }
   0x7   :  { %s1161_s23 = smov 0   ;;  %s1163_s24 = smov 0  }
   0x8   :  { %s1165_s25 = smov 0   ;;  %s1167_s26 = smov 0  }
   0x9 LB: > { %s729_s27 = sadd.s32 4294967295, %s1111_s26   ;;  %s730_s28 = sadd.s32 4294967294, %s1111_s26   ;;  %s1111_s26 = sphi %s1167_s26, %s27_s26   ;;  %s1107_s25 = sphi %s1165_s25, %s1514_s25   ;;  %s1103_s24 = sphi %s1163_s24, %s1513_s24   ;;  %s1099_s23 = sphi %s1161_s23, %s1512_s23   ;;  %s1095_s22 = sphi %s1159_s22, %s1511_s22   ;;  %s1091_s21 = sphi %s1157_s21, %s1510_s21  }
   0xa   : > { %p61_p0 = scmp.ne.s32.totalorder %s1095_s22, %s1091_s21  ;;  %p1191_p1 = scmp.eq.s32.totalorder %s729_s27, 0 }
   0xb   : > { %p1195_p2 = scmp.eq.s32.totalorder %s729_s27, 1  ;;  %p177_p3 = scmp.eq.s32.totalorder %s730_s28, 1 }
   0xc   : > { %s1494_s29 = scalar_select %p1191_p1, 1, 0 }
   0xd   : > { %p1201_p4 = por %p1191_p1, %p61_p0  ;;  %p731_p5 = scmp.ge.s32.totalorder %s1111_s26, 1 }
   0xe   : > { %p1206_p6 = por %p177_p3, %p61_p0  ;;  %p212_p7 = scmp.lt.s32.totalorder %s1111_s26, 3 }
   0xf   : > { %s1496_s7 = scalar_select %p1201_p4, 1, 0 }
  0x10   : > { %s1497_s8 = scalar_select %p1206_p6, 1, 0 }
  0x11   : > { %p1211_p8 = pnand %p731_p5, %p212_p7  ;;  %s1113_s10 = smov [#allocation5]  }
  0x12   : > { %1498 = sst [smem:[#allocation15_spill]] %s1497_s8  ;;  %s230_s11 = sshll.u32 %s1113_s10, 4  ;;  %s1215_s11 = int_to_ptr.vmem [resolvable:$true] %s230_s11 }
  0x13   : > { %p825_p9 = pneg %p1211_p8  ;;  %s1114_s13 = smov [#allocation7]  }
  0x14   : > { %s243_s14 = sshll.u32 %s1114_s13, 4  ;;  %s907_s17 = scalar_lea.hbm %s1484_s3, 512  ;;  %s1226_s14 = int_to_ptr.vmem [resolvable:$true] %s243_s14 }
  0x15   : > { %p1222_p11 = pnand %p825_p9, %p1191_p1  ;;  %p908_p12 = scmp.ne.s32.totalorder %s1484_s3, %s907_s17 }
  0x16   : > { %p914_p5 = scmp.lt.u32.totalorder %s907_s17, %s1484_s3 }
  0x17   : > { %p909_p13 = pneg %p1222_p11 }
  0x19   : > { %p910_p0 = pnand %p909_p13, %p908_p12 }
  0x1b   : > { %p911_p3 = pneg %p910_p0 }
  0x1d   : > { %p916_p7 = pnand %p914_p5, %p911_p3 }
  0x1f   : > { %919 = shalt.err (!%p916_p7)
}
  0x20   : > { %s920_s28 = scalar_lea.vmem %s1215_s11, 512  ;;  %p928_p1 = scmp.lt.s32.totalorder %s1215_s11, %s1215_s11 }
  0x21   : > { %p921_p9 = scmp.ne.s32.totalorder %s1215_s11, %s920_s28  ;;  %p929_p12 = scmp.lt.s32.totalorder %s920_s28, %s920_s28 }
  0x23   : > { %p923_p10 = pnand %p921_p9, %p909_p13  ;;  %p930_p0 = por %p929_p12, %p928_p1 }
  0x25   : > { %p924_p6 = pneg %p923_p10 }
  0x27   : > { %p931_p4 = pnand %p930_p0, %p924_p6 }
  0x29   : > { %934 = shalt.err (!%p931_p4)
}
  0x2a   : > { %s1492_s10 = smov 128   ;;  %s1116_s13 = smov 8  }
  0x2b   : > { %828 = dma.hbm_to_vmem [thread:$0]  (!%p1222_p11), %s1484_s3, 512, %s1215_s11, [#allocation6], %s1492_s10, %s1492_s10, %s1116_s13  }
  0x2c   : > { %s935_s19 = scalar_lea.hbm %s1485_s4, 512 }
  0x2d   : > { %p936_p1 = scmp.ne.s32.totalorder %s1485_s4, %s935_s19  ;;  %p942_p10 = scmp.lt.u32.totalorder %s935_s19, %s1485_s4 }
  0x2f   : > { %p938_p4 = pnand %p936_p1, %p909_p13 }
  0x31   : > { %p939_p6 = pneg %p938_p4 }
  0x33   : > { %p944_p3 = pnand %p942_p10, %p939_p6 }
  0x35   : > { %947 = shalt.err (!%p944_p3)
}
  0x36   : > { %s948_s11 = scalar_lea.vmem %s1226_s14, 512  ;;  %p956_p12 = scmp.lt.s32.totalorder %s1226_s14, %s1226_s14 }
  0x37   : > { %p949_p5 = scmp.ne.s32.totalorder %s1226_s14, %s948_s11  ;;  %p957_p0 = scmp.lt.s32.totalorder %s948_s11, %s948_s11 }
  0x39   : > { %p951_p7 = pnand %p949_p5, %p909_p13  ;;  %p958_p1 = por %p957_p0, %p956_p12 }
  0x3b   : > { %p952_p9 = pneg %p951_p7 }
  0x3d   : > { %p959_p4 = pnand %p958_p1, %p952_p9 }
  0x3f   : > { %962 = shalt.err (!%p959_p4)
}
  0x40   : > { %831 = dma.hbm_to_vmem [thread:$0]  (!%p1222_p11), %s1485_s4, 512, %s1226_s14, [#allocation6], %s1492_s10, %s1492_s10, %s1116_s13  }
  0x41   : > { %s39_s12 = sadd.s32 1, %s1107_s25  ;;  %s48_s16 = sadd.s32 1, %s1099_s23 }
  0x42   : > { %p41_p13 = scmp.ge.s32.totalorder %s39_s12, 2  ;;  %p55_p6 = scmp.ne.s32.totalorder %s1099_s23, %s1095_s22 }
  0x43   : > { %p56_p10 = scmp.eq.s32.totalorder %s1111_s26, 0  ;;  %p845_p3 = scmp.lt.s32.totalorder %s1111_s26, 2 }
  0x44   : > { %s1516_s12 = smov (%p41_p13, %s39_s12), 0  ;;  %p1296_p7 = por %p1195_p2, %p55_p6 }
  0x45   : > { %p57_p5 = por %p56_p10, %p55_p6  ;;  %s43_s18 = ssub.s32 %s1107_s25, %s1516_s12 }
  0x46   : > { %s1501_s17 = scalar_select %p1296_p7, 1, 0 }
  0x47   : > { %s257_s19 = sand.u32 1, %s1099_s23   ;;  %p46_p9 = scmp.eq.s32.totalorder %s43_s18, 0 }
  0x48   : > { %s735_s14 = sshll.u32 %s257_s19, 4  ;;  %s758_s20 = sshll.u32 %s1107_s25, 8 }
  0x49   : > { %s1305_s27 = scalar_select %p46_p9, %s1099_s23, %s48_s16  }
  0x4a   : > { %s1310_s8 = scalar_lea.hbm %s1481_s0, %s758_s20  ;;  %s261_s30 = scalar_lea.vmem [#allocation2], %s735_s14 }
  0x4b   : > { %s270_s15 = sshll.u32 %s261_s30, 4  ;;  %p1314_p2 = pnand %p845_p3, %p57_p5  ;;  %s1318_s15 = int_to_ptr.vmem [resolvable:$true] %s270_s15 }
  0x4c   : > { %s1320_s16 = scalar_lea.sflag [#allocation3], %s257_s19  ;;  %s963_s18 = scalar_lea.hbm %s1310_s8, 256 }
  0x4d   : > { %p964_p11 = scmp.ne.s32.totalorder %s1310_s8, %s963_s18  ;;  %p965_p12 = pneg %p1314_p2 }
  0x4e   : > { %s968_s28 = scalar_lea.hbm %s1481_s0, 512  ;;  %p969_p4 = scmp.lt.u32.totalorder %s1310_s8, %s1481_s0 }
  0x4f   : > { %p966_p0 = pnand %p965_p12, %p964_p11  ;;  %p970_p13 = scmp.lt.u32.totalorder %s968_s28, %s963_s18 }
  0x50   : > { %p972_p10 = scmp.lt.u32.totalorder %s963_s18, %s1310_s8 }
  0x51   : > { %p967_p1 = pneg %p966_p0  ;;  %p971_p6 = por %p970_p13, %p969_p4 }
  0x53   : > { %p973_p3 = por %p972_p10, %p971_p6 }
  0x55   : > { %p974_p5 = pnand %p973_p3, %p967_p1 }
  0x57   : > { %977 = shalt.err (!%p974_p5)
}
  0x58   : > { %s978_s19 = scalar_lea.vmem %s1318_s15, 256  ;;  %s1117_s14 = smov [#allocation2]  }
  0x59   : > { %p979_p9 = scmp.ne.s32.totalorder %s1318_s15, %s978_s19  ;;  %s983_s20 = sshll.u32 %s1117_s14, 4  ;;  %s984_s20 = int_to_ptr.vmem [resolvable:$false] %s983_s20 }
  0x5a   : > { %s985_s11 = scalar_lea.vmem %s984_s20, 512  ;;  %p986_p7 = scmp.lt.s32.totalorder %s1318_s15, %s984_s20 }
  0x5b   : > { %p981_p11 = pnand %p979_p9, %p965_p12  ;;  %p987_p4 = scmp.lt.s32.totalorder %s985_s11, %s978_s19 }
  0x5d   : > { %p982_p0 = pneg %p981_p11  ;;  %p988_p13 = por %p987_p4, %p986_p7 }
  0x5f   : > { %p989_p6 = pnand %p988_p13, %p982_p0 }
  0x61   : > { %992 = shalt.err (!%p989_p6)
}
  0x62   : > { %s1503_s18 = smov 128   ;;  %282 = sbr.rel (%p1211_p8) target bundleno = 678 (0x2a6), region = 40 }
  0x63   : > { %835 = dma.hbm_to_vmem [thread:$0]  (!%p1314_p2), %s1310_s8, 256, %s1318_s15, %s1320_s16, %s1503_s18, %s1503_s18, %s1116_s13  }
  0x64   : > { %s1354_s28 = sand.u32 (!%p1211_p8), 1, %s1095_s22   ;;  %p1504_p7 = scmp.ne.s32.totalorder (!%p1211_p8), %s1496_s7, 0 }
  0x65   : > { %s1357_s30 = sshll.u32 (!%p1211_p8), %s1354_s28, 4  ;;  %s285_s10 = scalar_lea.sflag (!%p1211_p8), [#allocation3], %s1354_s28 }
  0x66   : > { %s288_s19 = scalar_lea.vmem (!%p1211_p8), [#allocation2], %s1357_s30 }
  0x69   : > { %1074 = dma.done.wait (%p1504_p7), %s285_s10, 256  }
  0x6a   : > { %1076 = vsyncadd (%p1504_p7), %s285_s10, 4294967040  ;;  %p1505_p2 = scmp.ne.s32.totalorder %s1494_s29, 0 }
  0x6c   : > { %1078 = dma.done.wait (%p1505_p2), [#allocation6], 1024  }
  0x6d   : > { %1080 = vsyncadd (%p1505_p2), [#allocation6], 4294966272  ;;  %vm337_vm0 = vcmask 261120   ;;  %v333_v0 = vld [vmem:[%s288_s19] sm:$0xff]  ;;  %v334_v1 = vld [vmem:[%s288_s19 + $0x8] sm:$0xff]  ;;  %s322_s8 = scalar_lea.vmem [#allocation8], %s1357_s30 }
  0x6e   : > { %v338_v2 = vsel %vm337_vm0, %v333_v0, 0.0  ;;  %v341_v3 = vsel %vm337_vm0, %v334_v1, 0.0  ;;  %v381_v14 = vld [vmem:[#allocation5] sm:$0xff]  ;;  %v382_v15 = vld [vmem:[#allocation5 + $0x8] sm:$0xff]  ;;  %v383_v19 = vld [vmem:[#allocation5 + $0x10] sm:$0xff]  ;;  %s570_s15 = sshll.u32 %s322_s8, 4  ;;  %s1386_s15 = int_to_ptr.vmem [resolvable:$true] %s570_s15 }
  0x6f   : > { %339 = vadd.xlane.f32.xlu0 %v338_v2  ;;  %v468_v16 = vld [vmem:[#allocation7] sm:$0xff]  ;;  %v795_v17 = vpack.c.bf16 %v382_v15, %v381_v14  ;;  %v469_v18 = vld [vmem:[#allocation7 + $0x8] sm:$0xff]  ;;  %v384_v20 = vld [vmem:[#allocation5 + $0x18] sm:$0xff]  ;;  %s329_s16 = scalar_lea.vmem [#allocation9], %s1357_s30  ;;  %s759_s20 = sshll.u32 %s1103_s24, 8 }
  0x70   : > { %v803_v21 = vpack.c.bf16 %v469_v18, %v468_v16  ;;  %v799_v22 = vpack.c.bf16 %v384_v20, %v383_v19  ;;  %v470_v23 = vld [vmem:[#allocation7 + $0x10] sm:$0xff]  ;;  %v471_v24 = vld [vmem:[#allocation7 + $0x18] sm:$0xff]  ;;  %v744_v33 = vld [vmem:[%s1482_s1] ss:$0 sm:$0xff]  ;;  %s588_s14 = sshll.u32 %s329_s16, 4  ;;  %s1393_s10 = scalar_lea.hbm %s1486_s5, %s759_s20  ;;  %s1388_s14 = int_to_ptr.vmem [resolvable:$true] %s588_s14 }
  0x71   : > { %796 = vmatprep.subr.bf16.mxu0 %v795_v17  ;;  %v807_v25 = vpack.c.bf16 %v471_v24, %v470_v23  ;;  %v745_v35 = vld [vmem:[%s1483_s2] ss:$0 sm:$0xff]  ;;  %s1400_s19 = scalar_lea.hbm %s1487_s6, %s759_s20  ;;  %s550_s29 = scalar_lea.sflag [#allocation4], %s1354_s28 }
  0x72   : > { %804 = vmatprep.subr.bf16.mxu1 %v803_v21  ;;  %798 = vmatpush3.bf16.msra.mxu0 %v795_v17  ;;  %s993_s7 = scalar_lea.vmem %s1386_s15, 256  ;;  %p1506_p12 = scmp.ne.s32.totalorder %s1501_s17, 0 }
  0x73   : > { %342 = vadd.xlane.f32.xlu0 %v341_v3  ;;  %806 = vmatpush3.bf16.msra.mxu1 %v803_v21  ;;  %p994_p8 = scmp.ne.s32.totalorder %s1386_s15, %s993_s7  ;;  %s1118_s9 = smov [#allocation8]  }
  0x74   : > { %800 = vmatprep.subr.bf16.mxu0 %v799_v22  ;;  %808 = vmatprep.subr.bf16.mxu1 %v807_v25  ;;  %s997_s13 = sshll.u32 %s1118_s9, 4  ;;  %s998_s13 = int_to_ptr.vmem [resolvable:$false] %s997_s13 }
  0x75   : > { %p995_p1 = pnand %p994_p8, %p1506_p12  ;;  %s999_s11 = scalar_lea.vmem %s998_s13, 512 }
  0x76   : > { %802 = vmatpush3.bf16.msra.mxu0 %v799_v22  ;;  %p1000_p3 = scmp.lt.s32.totalorder %s1386_s15, %s998_s13  ;;  %p1001_p5 = scmp.lt.s32.totalorder %s999_s11, %s993_s7 }
  0x77   : > { %810 = vmatpush3.bf16.msra.mxu1 %v807_v25  ;;  %p996_p10 = pneg %p995_p1 }
  0x78   : > { %p1002_p9 = por %p1001_p5, %p1000_p3 }
  0x7a   : > { %p1003_p11 = pnand %p1002_p9, %p996_p10 }
  0xfc   : > { %v340_v4 = vpop.xlane.xlu0 %339 }
  0xfd   : > { %v345_v5 = vmul.f32 0.03125, %v340_v4 }
  0xff   : > { %v347_v6 = vsub.f32 %v333_v0, %v345_v5 }
 0x100   : > { %v343_v7 = vpop.xlane.xlu0 %342 }
 0x101   : > { %v346_v8 = vmul.f32 0.03125, %v343_v7  ;;  %v349_v9 = vmul.f32 %v347_v6, %v347_v6 }
 0x103   : > { %v348_v10 = vsub.f32 %v334_v1, %v346_v8  ;;  %v351_v11 = vsel %vm337_vm0, %v349_v9, 0.0 }
 0x104   : > { %352 = vadd.xlane.f32.xlu1 %v351_v11 }
 0x105   : > { %v350_v12 = vmul.f32 %v348_v10, %v348_v10 }
 0x107   : > { %v354_v13 = vsel %vm337_vm0, %v350_v12, 0.0 }
 0x108   : > { %355 = vadd.xlane.f32.xlu1 %v354_v13 }
 0x191   : > { %v353_v26 = vpop.xlane.xlu1 %352 }
 0x192   : > { %v357_v27 = vmul.f32 0.03125, %v353_v26 }
 0x194   : > { %v359_v28 = vadd.f32 1e-05, %v357_v27 }
 0x195   : > { %v356_v29 = vpop.xlane.xlu1 %355 }
 0x196   : > { %903 = vrsqrt.f32 %v359_v28  ;;  %v358_v30 = vmul.f32 0.03125, %v356_v29 }
 0x198   : > { %v360_v31 = vadd.f32 1e-05, %v358_v30 }
 0x19a   : > { %905 = vrsqrt.f32 %v360_v31 }
 0x1a0   : > { %v904_v32 = vpop.eup %903 }
 0x1a1   : > { %v363_v34 = vmul.f32 %v904_v32, %v347_v6 }
 0x1a3   : > { %v371_v36 = vmul.f32 %v744_v33, %v363_v34 }
 0x1a4   : > { %v906_v37 = vpop.eup %905 }
 0x1a5   : > { %v364_v38 = vmul.f32 %v906_v37, %v348_v10  ;;  %v379_v39 = vadd.f32 %v745_v35, %v371_v36 }
 0x1a7   : > { %v372_v40 = vmul.f32 %v744_v33, %v364_v38  ;;  %781 = vmatprep.mubr.msk.f32.mxu0 %vm337_vm0, %v379_v39  ;;  %792 = vmatprep.mubr.msk.f32.mxu1 %vm337_vm0, %v379_v39 }
 0x1a9   : > { %v380_v41 = vadd.f32 %v745_v35, %v372_v40 }
 0x1ab   : > { %782 = vmatmul.mubr.msk.f32.vlgmr.msra.gmra.mrb[0].mxu0 %vm337_vm0, %v380_v41  ;;  %793 = vmatmul.mubr.msk.f32.vlgmr.msra.gmra.mrb[0].mxu1 %vm337_vm0, %v380_v41 }
 0x27e   : > { %v783_v42 = vpop.f32.mrb[0].mxu0  ;;  %v794_v43 = vpop.f32.mrb[0].mxu1 }
 0x27f   : > { %467 = vst.msk [vmem:[%s322_s8 + $0x8] sm:$0xff] %vm337_vm0, %v783_v42  ;;  %548 = vst.msk [vmem:[%s329_s16 + $0x8] sm:$0xff] %vm337_vm0, %v794_v43  ;;  %v457_v44 = vpop.f32.mrb[1].mxu0  ;;  %v538_v45 = vpop.f32.mrb[1].mxu1 }
 0x280   : > { %466 = vst.msk [vmem:[%s322_s8] sm:$0xff] %vm337_vm0, %v457_v44  ;;  %547 = vst.msk [vmem:[%s329_s16] sm:$0xff] %vm337_vm0, %v538_v45 }
 0x281   : > { %1006 = shalt.err (!%p1003_p11)
}
 0x282   : > { %s1007_s8 = scalar_lea.hbm %s1393_s10, 256  ;;  %s1011_s18 = scalar_lea.hbm %s1486_s5, 512 }
 0x283   : > { %p1008_p0 = scmp.ne.s32.totalorder %s1393_s10, %s1007_s8  ;;  %p1012_p6 = scmp.lt.u32.totalorder %s1393_s10, %s1486_s5 }
 0x284   : > { %p1013_p7 = scmp.lt.u32.totalorder %s1011_s18, %s1007_s8  ;;  %p1015_p8 = scmp.lt.u32.totalorder %s1007_s8, %s1393_s10 }
 0x285   : > { %p1009_p4 = pnand %p1008_p0, %p1506_p12 }
 0x286   : > { %p1014_p2 = por %p1013_p7, %p1012_p6 }
 0x287   : > { %p1010_p13 = pneg %p1009_p4 }
 0x288   : > { %p1016_p1 = por %p1015_p8, %p1014_p2 }
 0x28a   : > { %p1017_p10 = pnand %p1016_p1, %p1010_p13 }
 0x28c   : > { %1020 = shalt.err (!%p1017_p10)
}
 0x28d   : > { %s1119_s7 = smov 128   ;;  %s1120_s9 = smov 8  }
 0x28e   : > { %821 = dma.vmem_to_hbm [thread:$0]  (%p1506_p12), %s1386_s15, 256, %s1393_s10, %s550_s29, %s1119_s7, %s1119_s7, %s1120_s9  }
 0x28f   : > { %s555_s13 = scalar_lea.sflag [#allocation10], %s1354_s28  ;;  %s1021_s11 = scalar_lea.vmem %s1388_s14, 256 }
 0x290   : > { %p1022_p3 = scmp.ne.s32.totalorder %s1388_s14, %s1021_s11  ;;  %s1121_s8 = smov [#allocation9]  }
 0x291   : > { %s1025_s16 = sshll.u32 %s1121_s8, 4  ;;  %s1026_s16 = int_to_ptr.vmem [resolvable:$false] %s1025_s16 }
 0x292   : > { %p1023_p5 = pnand %p1022_p3, %p1506_p12  ;;  %s1027_s20 = scalar_lea.vmem %s1026_s16, 512 }
 0x293   : > { %p1028_p11 = scmp.lt.s32.totalorder %s1388_s14, %s1026_s16  ;;  %p1029_p0 = scmp.lt.s32.totalorder %s1027_s20, %s1021_s11 }
 0x294   : > { %p1024_p9 = pneg %p1023_p5 }
 0x295   : > { %p1030_p4 = por %p1029_p0, %p1028_p11 }
 0x297   : > { %p1031_p13 = pnand %p1030_p4, %p1024_p9 }
 0x299   : > { %1034 = shalt.err (!%p1031_p13)
}
 0x29a   : > { %s1035_s15 = scalar_lea.hbm %s1400_s19, 256  ;;  %s1039_s18 = scalar_lea.hbm %s1487_s6, 512 }
 0x29b   : > { %p1036_p6 = scmp.ne.s32.totalorder %s1400_s19, %s1035_s15  ;;  %p1040_p8 = scmp.lt.u32.totalorder %s1400_s19, %s1487_s6 }
 0x29c   : > { %p1041_p1 = scmp.lt.u32.totalorder %s1039_s18, %s1035_s15  ;;  %p1043_p3 = scmp.lt.u32.totalorder %s1035_s15, %s1400_s19 }
 0x29d   : > { %p1037_p7 = pnand %p1036_p6, %p1506_p12 }
 0x29e   : > { %p1042_p10 = por %p1041_p1, %p1040_p8 }
 0x29f   : > { %p1038_p2 = pneg %p1037_p7 }
 0x2a0   : > { %p1044_p5 = por %p1043_p3, %p1042_p10 }
 0x2a2   : > { %p1045_p9 = pnand %p1044_p5, %p1038_p2 }
 0x2a4   : > { %1048 = shalt.err (!%p1045_p9)
}
 0x2a5   : > { %822 = dma.vmem_to_hbm [thread:$0]  (%p1506_p12), %s1388_s14, 256, %s1400_s19, %s555_s13, %s1119_s7, %s1119_s7, %s1120_s9  }
 0x2a6 PF: > { %s1507_s11 = sld [smem:[#allocation15_spill]]  ;;  %s603_s8 = sand.u32 1, %s1091_s21  }
 0x2a7   : > { %p1509_p0 = scmp.ge.s32.totalorder %s1111_s26, 2  ;;  %s604_s16 = scalar_lea.sflag [#allocation4], %s603_s8 }
 0x2ac   : > { %p1508_p11 = scmp.ne.s32.totalorder %s1507_s11, 0 }
 0x2ae   : > { %p837_p4 = pnand %p1509_p0, %p1508_p11 }
 0x2b0   : > { %1082 = dma.done.wait (!%p837_p4), %s604_s16, 256  }
 0x2b1   : > { %1084 = vsyncadd (!%p837_p4), %s604_s16, 4294967040  ;;  %s613_s17 = scalar_lea.sflag [#allocation10], %s603_s8 }
 0x2b2   : > { %1086 = dma.done.wait (!%p837_p4), %s613_s17, 256  }
 0x2b3   : > { %1088 = vsyncadd (!%p837_p4), %s613_s17, 4294967040  ;;  %s27_s26 = sadd.s32 1, %s1111_s26   ;;  %s1510_s21 = smov %s1095_s22 }
 0x2b4   : > { %p24_p13 = scmp.ge.s32.totalorder %s27_s26, 4   ;;  %s1511_s22 = smov %s1099_s23 }
 0x2b5   : > { %s1512_s23 = smov %s1305_s27  ;;  %s1513_s24 = smov %s1107_s25 }
 0x2b6   : > { %s1514_s25 = smov %s1516_s12  ;;  %26 = sbr.rel (!%p24_p13) target bundleno = 9 (0x9), region = 110 }
 0x2bd   :  { %618 = vsyncpa [#allocation3], 1 }
 0x2be   :  { %620 = vsyncpa [#allocation3 + $0x1], 1 }
 0x2bf   :  { %621 = vsyncpa [#allocation6], 1 }
 0x2c0   :  { %622 = vsyncpa [#allocation4], 1 }
 0x2c1   :  { %624 = vsyncpa [#allocation4 + $0x1], 1 }
 0x2c2   :  { %625 = vsyncpa [#allocation10], 1 }
 0x2c3   :  { %627 = vsyncpa [#allocation10 + $0x1], 1 }

</bundles_post_ra>
